<compile_context>
chip_gen: v6e
topology: v6e:2x2x1
jax: 0.10.0
libtpu: 0.0.40
codegen_flags: <defaults>
</compile_context>

<pallas_src>
import functools

import jax
import jax.numpy as jnp
from jax.experimental import pallas as pl
from jax.experimental.pallas import tpu as pltpu


def _upsample_sep_kernel(rows_ref, cols_ref, x_ref, o_ref, *, compute_dtype):
    # rows_ref: (H_out, H_in)  one-hot row selection  (out row i <- in row ri[i])
    # cols_ref: (W_in, W_out)  one-hot col selection  (out col k <- in col ci[k])
    # x_ref:    (m_blk, H_in, W_in)   block of flattened N*C planes
    # o_ref:    (m_blk, H_out, W_out) upsampled planes
    m_blk = x_ref.shape[0]
    x = x_ref[...].astype(compute_dtype)

    # Broadcast the tiny selection matrices along the plane (batch) axis so
    # both stages are canonical batched matmuls (batch dim on both operands).
    rows = jnp.broadcast_to(rows_ref[...], (m_blk,) + rows_ref.shape)
    cols = jnp.broadcast_to(cols_ref[...], (m_blk,) + cols_ref.shape)

    # Row gather: u[m, i, w] = sum_h rows[i, h] * x[m, h, w] = x[m, ri[i], w]
    u = jnp.einsum("moh,mhw->mow", rows, x,
                   preferred_element_type=compute_dtype)
    # Column replicate: out[m, i, k] = sum_w u[m, i, w] * cols[w, k]
    #                                = x[m, ri[i], ci[k]]
    out = jnp.einsum("mow,mwk->mok", u, cols,
                     preferred_element_type=jnp.float32)
    o_ref[...] = out.astype(o_ref.dtype)


def _vmem_config():
    """Generation-aware (budget_bytes, vmem_limit_bytes, mxu_m_align)."""
    try:
        kind = jax.devices()[0].device_kind.lower()
    except Exception:  # pragma: no cover - defensive
        kind = ""
    mib = 1024 * 1024
    if "v7" in kind:          # 64 MiB physical VMEM per TensorCore
        return 36 * mib, 48 * mib, 256
    if "v6" in kind:          # 128 MiB physical
        return 80 * mib, 100 * mib, 256
    if "v5" in kind:          # 128 MiB physical, but 16 MiB scoped default
        return 80 * mib, 100 * mib, 128
    # Unknown generation: stay under every scoped default, don't touch limit.
    return 12 * mib, None, 128


def nearest_upsample_2d(x, size):
    """x: (N, C, H_in, W_in); size: (H_out, W_out) -> (N, C, H_out, W_out)."""
    N, C, H_in, W_in = x.shape
    H_out, W_out = size
    NC = N * C
    K_in, K_out = H_in * W_in, H_out * W_out

    # Selection is an exact copy in any float dtype, so bf16 stays bf16.
    if jnp.issubdtype(x.dtype, jnp.floating):
        compute_dtype = x.dtype
    else:
        # TODO(synk): integer inputs with |value| > 2^24 lose precision on the
        # f32 selection path; an in-kernel integer gather would avoid it.
        compute_dtype = jnp.float32

    # PyTorch 'nearest' source index: src = floor(dst * in / out)
    ri = (jnp.arange(H_out) * H_in) // H_out                     # (H_out,)
    ci = (jnp.arange(W_out) * W_in) // W_out                     # (W_out,)
    rows_oh = (ri[:, None] == jnp.arange(H_in)[None, :]).astype(compute_dtype)
    cols_oh = (jnp.arange(W_in)[:, None] == ci[None, :]).astype(compute_dtype)

    # ---- VMEM accounting (everything that lives per grid step) ----
    budget, vmem_limit, mxu_align = _vmem_config()
    comp_b = jnp.dtype(compute_dtype).itemsize
    io_b = jnp.dtype(x.dtype).itemsize
    sel_elems = H_out * H_in + W_in * W_out
    fixed_bytes = 2 * comp_b * sel_elems            # double-buffered 2-D one-hots (KBs)
    per_plane_bytes = (
        2 * io_b * K_in                             # input block, double buffered
        + 2 * io_b * K_out                          # output block, double buffered
        + comp_b * sel_elems                        # broadcast selection operands
        + comp_b * (K_in + H_out * W_in)            # cast input + row-gathered u
        + 4 * K_out                                 # f32 accumulator of final matmul
    )
    raw = int(max(1, (budget - fixed_bytes) // per_plane_bytes))
    # TODO(synk): planes so large that a single output plane exceeds the VMEM
    # budget would additionally need spatial (H_out/W_out) tiling.

    # MXU / sublane friendly block of planes.
    if raw >= mxu_align:
        m_blk = (raw // mxu_align) * mxu_align
    elif raw >= 8:
        m_blk = (raw // 8) * 8
    else:
        m_blk = raw
    m_blk = min(m_blk, NC)
    # Keep >=2 grid steps when possible so v7x's two TensorCores both get work
    # (the plane axis is marked "parallel").
    if NC >= 16 and m_blk >= NC:
        m_blk = min(NC, ((pl.cdiv(NC, 2) + 7) // 8) * 8)
    m_blk = max(1, m_blk)

    grid = (pl.cdiv(NC, m_blk),)
    x3 = x.reshape(NC, H_in, W_in)        # free reshape of contiguous NCHW

    cp_kwargs = dict(dimension_semantics=("parallel",))
    if vmem_limit is not None:
        cp_kwargs["vmem_limit_bytes"] = int(vmem_limit)

    out3 = pl.pallas_call(
        functools.partial(_upsample_sep_kernel, compute_dtype=compute_dtype),
        out_shape=jax.ShapeDtypeStruct((NC, H_out, W_out), x.dtype),
        grid=grid,
        in_specs=[
            pl.BlockSpec((H_out, H_in), lambda i: (0, 0)),   # row one-hot (VMEM resident)
            pl.BlockSpec((W_in, W_out), lambda i: (0, 0)),   # col one-hot (VMEM resident)
            pl.BlockSpec((m_blk, H_in, W_in), lambda i: (i, 0, 0)),
        ],
        out_specs=pl.BlockSpec((m_blk, H_out, W_out), lambda i: (i, 0, 0)),
        compiler_params=pltpu.CompilerParams(**cp_kwargs),
    )(rows_oh, cols_oh, x3)

    return out3.reshape(N, C, H_out, W_out)


def _reference_nearest(x, size):
    """Pure-JAX reference matching F.interpolate(..., mode='nearest')."""
    N, C, H_in, W_in = x.shape
    H_out, W_out = size
    ri = (jnp.arange(H_out) * H_in) // H_out
    ci = (jnp.arange(W_out) * W_in) // W_out
    return x[:, :, ri[:, None], ci[None, :]]


if __name__ == "__main__":
    key = jax.random.PRNGKey(0)
    k1, k2, k3 = jax.random.split(key, 3)

    # Integer-scale case: (2, 4, 16, 16) -> (32, 32)
    x1 = jax.random.normal(k1, (2, 4, 16, 16), dtype=jnp.float32)
    out1 = jax.block_until_ready(nearest_upsample_2d(x1, (32, 32)))
    ref1 = _reference_nearest(x1, (32, 32))
    assert out1.shape == (2, 4, 32, 32)
    assert jnp.array_equal(out1, ref1), "mismatch on integer-scale f32 case"

    # Non-integer-scale case: (2, 4, 7, 5) -> (16, 12)
    x2 = jax.random.normal(k2, (2, 4, 7, 5), dtype=jnp.float32)
    out2 = jax.block_until_ready(nearest_upsample_2d(x2, (16, 12)))
    ref2 = _reference_nearest(x2, (16, 12))
    assert out2.shape == (2, 4, 16, 12)
    assert jnp.array_equal(out2, ref2), "mismatch on non-integer-scale case"

    # bf16 stays in bf16 end to end (selection is an exact copy)
    x3 = jax.random.normal(k3, (2, 4, 16, 16), dtype=jnp.bfloat16)
    out3 = jax.block_until_ready(nearest_upsample_2d(x3, (32, 32)))
    ref3 = _reference_nearest(x3, (32, 32))
    assert jnp.array_equal(out3, ref3), "mismatch on bf16 case"

    print("KERNEL_OK")
</pallas_src>

<mosaic_0001>
module attributes {stable_mosaic.version = 11 : i64} {
  func.func @_upsample_sep_kernel(%arg0: i32, %arg1: memref<32x16xf32, #tpu.memory_space<vmem>>, %arg2: memref<16x32xf32, #tpu.memory_space<vmem>>, %arg3: memref<8x16x16xf32, #tpu.memory_space<vmem>>, %arg4: memref<8x32x32xf32, #tpu.memory_space<vmem>>) attributes {dimension_semantics = [#tpu.dimension_semantics<parallel>], iteration_bounds = array<i64: 1>, scalar_prefetch = 0 : i64, scratch_operands = 0 : i64, tpu.core_type = #tpu.core_type<tc>, window_params = [{pipeline_mode = #tpu.pipeline_mode<synchronous>, transform_indices = @transform_0, window_bounds = array<i64: 32, 16>}, {pipeline_mode = #tpu.pipeline_mode<synchronous>, transform_indices = @transform_1, window_bounds = array<i64: 16, 32>}, {transform_indices = @transform_2, window_bounds = array<i64: 8, 16, 16>}, {transform_indices = @transform_3, window_bounds = array<i64: 8, 32, 32>}]} {
    %c0 = arith.constant 0 : index
    %c0_0 = arith.constant 0 : index
    %c0_1 = arith.constant 0 : index
    %0 = vector.load %arg3[%c0, %c0_0, %c0_1] : memref<8x16x16xf32, #tpu.memory_space<vmem>>, vector<8x16x16xf32>
    %c0_2 = arith.constant 0 : index
    %c0_3 = arith.constant 0 : index
    %1 = vector.load %arg1[%c0_2, %c0_3] : memref<32x16xf32, #tpu.memory_space<vmem>>, vector<32x16xf32>
    %2 = vector.shape_cast %1 : vector<32x16xf32> to vector<1x32x16xf32>
    %3 = vector.broadcast %2 : vector<1x32x16xf32> to vector<8x32x16xf32>
    %c0_4 = arith.constant 0 : index
    %c0_5 = arith.constant 0 : index
    %4 = vector.load %arg2[%c0_4, %c0_5] : memref<16x32xf32, #tpu.memory_space<vmem>>, vector<16x32xf32>
    %5 = vector.shape_cast %4 : vector<16x32xf32> to vector<1x16x32xf32>
    %6 = vector.broadcast %5 : vector<1x16x32xf32> to vector<8x16x32xf32>
    "tpu.trace_start"() <{level = 10 : i32, message = "moh,mhw->mow"}> : () -> ()
    %cst = arith.constant dense<0.000000e+00> : vector<8x32x16xf32>
    %7 = tpu.matmul %3, %0, %cst {dimension_numbers = #tpu.dot_dimension_numbers<[2], [1], [1], [2], [0, 0, 0, 1, 1, 2], [0], [0]>} : vector<8x32x16xf32>, vector<8x16x16xf32>, vector<8x32x16xf32> -> vector<8x32x16xf32>
    "tpu.trace_stop"() : () -> ()
    "tpu.trace_start"() <{level = 10 : i32, message = "mow,mwk->mok"}> : () -> ()
    %cst_6 = arith.constant dense<0.000000e+00> : vector<8x32x32xf32>
    %8 = tpu.matmul %7, %6, %cst_6 {dimension_numbers = #tpu.dot_dimension_numbers<[2], [1], [1], [2], [0, 0, 0, 1, 1, 2], [0], [0]>} : vector<8x32x16xf32>, vector<8x16x32xf32>, vector<8x32x32xf32> -> vector<8x32x32xf32>
    "tpu.trace_stop"() : () -> ()
    %c0_7 = arith.constant 0 : index
    %c0_8 = arith.constant 0 : index
    %c0_9 = arith.constant 0 : index
    %9 = vector.load %arg4[%c0_7, %c0_8, %c0_9] : memref<8x32x32xf32, #tpu.memory_space<vmem>>, vector<8x32x32xf32>
    tpu.vector_store %arg4[%c0_7, %c0_8, %c0_9], %8 {strides = array<i32>} : memref<8x32x32xf32, #tpu.memory_space<vmem>>, vector<8x32x32xf32>,
    return
  }
  func.func @transform_0(%arg0: i32) -> (i32, i32) {
    %c0_i32 = arith.constant 0 : i32
    %c0_i32_0 = arith.constant 0 : i32
    %c0_i32_1 = arith.constant 0 : i32
    return %c0_i32, %c0_i32_0 : i32, i32
  }
  func.func @transform_1(%arg0: i32) -> (i32, i32) {
    %c0_i32 = arith.constant 0 : i32
    %c0_i32_0 = arith.constant 0 : i32
    %c0_i32_1 = arith.constant 0 : i32
    return %c0_i32, %c0_i32_0 : i32, i32
  }
  func.func @transform_2(%arg0: i32) -> (i32, i32, i32) {
    %c0_i32 = arith.constant 0 : i32
    %c0_i32_0 = arith.constant 0 : i32
    %c0_i32_1 = arith.constant 0 : i32
    return %arg0, %c0_i32, %c0_i32_0 : i32, i32, i32
  }
  func.func @transform_3(%arg0: i32) -> (i32, i32, i32) {
    %c0_i32 = arith.constant 0 : i32
    %c0_i32_0 = arith.constant 0 : i32
    %c0_i32_1 = arith.constant 0 : i32
    return %arg0, %c0_i32, %c0_i32_0 : i32, i32, i32
  }
}

</mosaic_0001>

<bundles_post_ra>
// kernel: tpu_custom_call.1
= control target key start
LH: loop header
LB: loop body
LE: loop exit
PB: predicated region body
PF: predicated region fallthrough
CT: control target
= control target key end

     0   :  { %8 = vsyncpa [#allocation3], 0  ;;  %s2154_s0 = inlined_call_operand.vmem [shape: f32[32,16], index: 0, kind: input, shape index: {}]   ;;  %s2155_s1 = inlined_call_operand.vmem [shape: f32[16,32], index: 1, kind: input, shape index: {}]   ;;  %s2156_s2 = inlined_call_operand.hbm [shape: f32[8,16,16], index: 2, kind: input, shape index: {}]   ;;  %s2157_s3 = inlined_call_operand.hbm [shape: f32[8,32,32], index: 3, kind: output, shape index: {}]  }
   0x1   :  { %9 = vsyncpa [#allocation4], 0  ;;  %s1938_s12 = smov [#allocation2]  }
   0x2   :  { %s19_s13 = sshll.u32 %s1938_s12, 4  ;;  %s20_s13 = int_to_ptr.vmem [resolvable:$true] %s19_s13 }
   0x3   :  { %s1902_s14 = scalar_lea.vmem %s20_s13, 2048  ;;  %p1907_p1 = scmp.lt.s32.totalorder %s20_s13, %s20_s13 }
   0x4   :  { %p1903_p0 = scmp.ne.s32.totalorder %s20_s13, %s1902_s14  ;;  %p1908_p2 = scmp.lt.s32.totalorder %s1902_s14, %s1902_s14 }
   0x6   :  { %p1909_p3 = por %p1908_p2, %p1907_p1 }
   0x8   :  { %p1910_p4 = pnand %p1909_p3, %p1903_p0 }
   0xa   :  { %1913 = shalt.err (!%p1910_p4)
}
   0xb   :  { %s1939_s15 = smov 128   ;;  %s1940_s16 = smov 8  }
   0xc   :  { %25 = dma.hbm_to_vmem [thread:$0]  %s2156_s2, 2048, %s20_s13, [#allocation3], %s1939_s15, %s1939_s15, %s1940_s16  }
   0xd   :  { %1934 = dma.done.wait [#allocation3], 2048  }
   0xe   :  { %1935 = vsyncadd [#allocation3], 4294965248  ;;  %v30_v0 = vld [vmem:[#allocation2 + $0x8] sm:$0xff]  ;;  %v32_v1 = vld [vmem:[#allocation2 + $0x18] sm:$0xff]  ;;  %vm51_vm0 = vcmask 130048   ;;  %vm1520_vm1 = vcmask 261120  }
   0xf   :  { %v29_v2 = vld [vmem:[#allocation2] sm:$0xff]  ;;  %1730 = vmatprep.subr.mxu0 %v30_v0  ;;  %1740 = vmatprep.subr.mxu1 %v32_v1  ;;  %v31_v3 = vld [vmem:[#allocation2 + $0x10] sm:$0xff]  ;;  %v1976_v5 = vld [vmem:[%s2154_s0 + $0x8] sm:$0xff] }
  0x10   :  { %v1971_v4 = vld [vmem:[%s2154_s0] sm:$0xff]  ;;  %1731 = vmatpush3.msra.mxu0 %v30_v0  ;;  %1741 = vmatpush3.msra.mxu1 %v32_v1  ;;  %v34_v6 = vld [vmem:[#allocation2 + $0x28] sm:$0xff]  ;;  %v36_v7 = vld [vmem:[#allocation2 + $0x38] sm:$0xff] }
  0x11   :  { %1732 = vmatprep.subr.mxu0 %v29_v2  ;;  %1742 = vmatprep.subr.mxu1 %v31_v3  ;;  %v47_v8 = vld [vmem:[%s2154_s0 + $0x10] sm:$0xff]  ;;  %v1992_v9 = vld [vmem:[%s2154_s0 + $0x18] sm:$0xff]  ;;  %v33_v10 = vld [vmem:[#allocation2 + $0x20] sm:$0xff] }
  0x12   :  { %1733 = vmatpush3.msra.mxu0 %v29_v2  ;;  %1734 = vmatprep.mubr.msk.f32.mxu0 %vm51_vm0, %v1971_v4  ;;  %v35_v11 = vld [vmem:[#allocation2 + $0x30] sm:$0xff]  ;;  %v38_v12 = vld [vmem:[#allocation2 + $0x48] sm:$0xff]  ;;  %v40_v13 = vld [vmem:[#allocation2 + $0x58] sm:$0xff] }
  0x13   :  { %1743 = vmatpush3.msra.mxu1 %v31_v3  ;;  %1744 = vmatprep.mubr.msk.f32.mxu1 %vm51_vm0, %v1971_v4  ;;  %v37_v14 = vld [vmem:[#allocation2 + $0x40] sm:$0xff]  ;;  %v39_v15 = vld [vmem:[#allocation2 + $0x50] sm:$0xff]  ;;  %v42_v16 = vld [vmem:[#allocation2 + $0x68] sm:$0xff] }
  0x14   :  { %1735 = vmatmul.mubr.msk.f32.vlgmr.msra.gmra.mxu0 %vm51_vm0, %v1976_v5  ;;  %1745 = vmatmul.mubr.msk.f32.vlgmr.msra.gmra.mxu1 %vm51_vm0, %v1976_v5  ;;  %v44_v17 = vld [vmem:[#allocation2 + $0x78] sm:$0xff]  ;;  %v41_v18 = vld [vmem:[#allocation2 + $0x60] sm:$0xff]  ;;  %v43_v19 = vld [vmem:[#allocation2 + $0x70] sm:$0xff] }
  0x15   :  { %1750 = vmatprep.subr.mxu0 %v34_v6  ;;  %1760 = vmatprep.subr.mxu1 %v36_v7  ;;  %v2035_v20 = vld [vmem:[%s2155_s1 + $0x8] sm:$0xff]  ;;  %v2054_v21 = vld [vmem:[%s2155_s1] sm:$0xff]  ;;  %s1941_s1 = smov [#allocation5]  }
  0x16   :  { %1751 = vmatpush3.msra.mxu0 %v34_v6  ;;  %1761 = vmatpush3.msra.mxu1 %v36_v7  ;;  %s1558_s29 = sshll.u32 %s1941_s1, 4  ;;  %s1559_s29 = int_to_ptr.vmem [resolvable:$true] %s1558_s29 }
  0x17   :  { %1737 = vmatprep.mubr.msk.f32.mxu0 %vm51_vm0, %v47_v8  ;;  %1747 = vmatprep.mubr.msk.f32.mxu1 %vm51_vm0, %v47_v8  ;;  %s1914_s30 = scalar_lea.vmem %s1559_s29, 4096  ;;  %p1919_p6 = scmp.lt.s32.totalorder %s1559_s29, %s1559_s29 }
  0x18   :  { %1738 = vmatmul.mubr.msk.f32.gmra.mxu0 %vm51_vm0, %v1992_v9  ;;  %1748 = vmatmul.mubr.msk.f32.gmra.mxu1 %vm51_vm0, %v1992_v9  ;;  %p1915_p5 = scmp.ne.s32.totalorder %s1559_s29, %s1914_s30  ;;  %p1920_p7 = scmp.lt.s32.totalorder %s1914_s30, %s1914_s30 }
  0x19   :  { %1752 = vmatprep.subr.mxu0 %v33_v10  ;;  %1762 = vmatprep.subr.mxu1 %v35_v11 }
  0x1a   :  { %1753 = vmatpush3.msra.mxu0 %v33_v10  ;;  %1763 = vmatpush3.msra.mxu1 %v35_v11  ;;  %p1921_p8 = por %p1920_p7, %p1919_p6 }
  0x1b   :  { %1754 = vmatprep.mubr.msk.f32.mxu0 %vm51_vm0, %v1971_v4  ;;  %1764 = vmatprep.mubr.msk.f32.mxu1 %vm51_vm0, %v1971_v4 }
  0x1c   :  { %1755 = vmatmul.mubr.msk.f32.vlgmr.msra.gmra.mxu0 %vm51_vm0, %v1976_v5  ;;  %1765 = vmatmul.mubr.msk.f32.vlgmr.msra.gmra.mxu1 %vm51_vm0, %v1976_v5  ;;  %p1922_p9 = pnand %p1921_p8, %p1915_p5 }
  0x1d   :  { %1770 = vmatprep.subr.mxu0 %v38_v12  ;;  %1780 = vmatprep.subr.mxu1 %v40_v13 }
  0x1e   :  { %1771 = vmatpush3.msra.mxu0 %v38_v12  ;;  %1781 = vmatpush3.msra.mxu1 %v40_v13 }
  0x1f   :  { %1757 = vmatprep.mubr.msk.f32.mxu0 %vm51_vm0, %v47_v8  ;;  %1767 = vmatprep.mubr.msk.f32.mxu1 %vm51_vm0, %v47_v8 }
  0x20   :  { %1758 = vmatmul.mubr.msk.f32.gmra.mxu0 %vm51_vm0, %v1992_v9  ;;  %1768 = vmatmul.mubr.msk.f32.gmra.mxu1 %vm51_vm0, %v1992_v9 }
  0x21   :  { %1772 = vmatprep.subr.mxu0 %v37_v14  ;;  %1782 = vmatprep.subr.mxu1 %v39_v15 }
  0x22   :  { %1773 = vmatpush3.msra.mxu0 %v37_v14  ;;  %1783 = vmatpush3.msra.mxu1 %v39_v15 }
  0x23   :  { %1774 = vmatprep.mubr.msk.f32.mxu0 %vm51_vm0, %v1971_v4  ;;  %1784 = vmatprep.mubr.msk.f32.mxu1 %vm51_vm0, %v1971_v4 }
  0x24   :  { %1775 = vmatmul.mubr.msk.f32.vlgmr.msra.gmra.mxu0 %vm51_vm0, %v1976_v5  ;;  %1785 = vmatmul.mubr.msk.f32.vlgmr.msra.gmra.mxu1 %vm51_vm0, %v1976_v5 }
  0x25   :  { %1790 = vmatprep.subr.mxu0 %v42_v16  ;;  %1800 = vmatprep.subr.mxu1 %v44_v17 }
  0x26   :  { %1791 = vmatpush3.msra.mxu0 %v42_v16  ;;  %1801 = vmatpush3.msra.mxu1 %v44_v17 }
  0x27   :  { %1777 = vmatprep.mubr.msk.f32.mxu0 %vm51_vm0, %v47_v8  ;;  %1787 = vmatprep.mubr.msk.f32.mxu1 %vm51_vm0, %v47_v8 }
  0x28   :  { %1778 = vmatmul.mubr.msk.f32.gmra.mxu0 %vm51_vm0, %v1992_v9  ;;  %1788 = vmatmul.mubr.msk.f32.gmra.mxu1 %vm51_vm0, %v1992_v9 }
  0x29   :  { %1792 = vmatprep.subr.mxu0 %v41_v18  ;;  %1802 = vmatprep.subr.mxu1 %v43_v19 }
  0x2a   :  { %1793 = vmatpush3.msra.mxu0 %v41_v18  ;;  %1803 = vmatpush3.msra.mxu1 %v43_v19 }
  0x2b   :  { %1794 = vmatprep.mubr.msk.f32.mxu0 %vm51_vm0, %v1971_v4  ;;  %1804 = vmatprep.mubr.msk.f32.mxu1 %vm51_vm0, %v1971_v4 }
  0x2c   :  { %1795 = vmatmul.mubr.msk.f32.vlgmr.msra.gmra.mxu0 %vm51_vm0, %v1976_v5  ;;  %1805 = vmatmul.mubr.msk.f32.vlgmr.msra.gmra.mxu1 %vm51_vm0, %v1976_v5 }
  0x2d   :  { %1797 = vmatprep.mubr.msk.f32.mxu0 %vm51_vm0, %v47_v8  ;;  %1807 = vmatprep.mubr.msk.f32.mxu1 %vm51_vm0, %v47_v8 }
  0x2e   :  { %1810 = vmatprep.subr.mxu0 %v2035_v20  ;;  %1820 = vmatprep.subr.mxu1 %v2035_v20 }
  0x2f   :  { %1811 = vmatpush3.msra.mxu0 %v2035_v20  ;;  %1821 = vmatpush3.msra.mxu1 %v2035_v20 }
  0x30   :  { %1798 = vmatmul.mubr.msk.f32.gmra.mxu0 %vm51_vm0, %v1992_v9  ;;  %1808 = vmatmul.mubr.msk.f32.gmra.mxu1 %vm51_vm0, %v1992_v9 }
  0x31   :  { %1812 = vmatprep.subr.mxu0 %v2054_v21  ;;  %1822 = vmatprep.subr.mxu1 %v2054_v21 }
  0x32   :  { %1813 = vmatpush3.msra.mxu0 %v2054_v21  ;;  %1823 = vmatpush3.msra.mxu1 %v2054_v21 }
  0x33   :  { %1830 = vmatprep.subr.mxu0 %v2035_v20  ;;  %1840 = vmatprep.subr.mxu1 %v2035_v20 }
  0xd4   :  { %v1736_v22 = vpop.f32.mrf.mxu0  ;;  %v1746_v23 = vpop.f32.mrf.mxu1 }
  0xd6   :  { %v130_v24 = vpop.f32.mrf.mxu0  ;;  %v215_v25 = vpop.f32.mrf.mxu1 }
  0xd7   :  { %1814 = vmatprep.mubr.msk.f32.mxu0 %vm51_vm0, %v130_v24  ;;  %1824 = vmatprep.mubr.msk.f32.mxu1 %vm51_vm0, %v215_v25 }
  0xd8   :  { %v1739_v26 = vpop.f32.mrf.mxu0  ;;  %v1749_v27 = vpop.f32.mrf.mxu1  ;;  %1815 = vmatmul.mubr.msk.f32.vlgmr.msra.gmra.mxu0 %vm51_vm0, %v1736_v22  ;;  %1825 = vmatmul.mubr.msk.f32.vlgmr.msra.gmra.mxu1 %vm51_vm0, %v1746_v23 }
  0xd9   :  { %1831 = vmatpush3.msra.mxu0 %v2035_v20  ;;  %1841 = vmatpush3.msra.mxu1 %v2035_v20 }
  0xda   :  { %v140_v28 = vpop.f32.mrf.mxu0  ;;  %v225_v29 = vpop.f32.mrf.mxu1  ;;  %1832 = vmatprep.subr.mxu0 %v2054_v21  ;;  %1842 = vmatprep.subr.mxu1 %v2054_v21 }
  0xdb   :  { %1817 = vmatprep.mubr.msk.f32.mxu0 %vm51_vm0, %v140_v28  ;;  %1827 = vmatprep.mubr.msk.f32.mxu1 %vm51_vm0, %v225_v29 }
  0xdc   :  { %v1756_v30 = vpop.f32.mrf.mxu0  ;;  %v1766_v31 = vpop.f32.mrf.mxu1  ;;  %1818 = vmatmul.mubr.msk.f32.gmra.mxu0 %vm51_vm0, %v1739_v26  ;;  %1828 = vmatmul.mubr.msk.f32.gmra.mxu1 %vm51_vm0, %v1749_v27 }
  0xdd   :  { %1833 = vmatpush3.msra.mxu0 %v2054_v21  ;;  %1843 = vmatpush3.msra.mxu1 %v2054_v21 }
  0xde   :  { %v300_v32 = vpop.f32.mrf.mxu0  ;;  %v385_v33 = vpop.f32.mrf.mxu1  ;;  %1850 = vmatprep.subr.mxu0 %v2035_v20  ;;  %1860 = vmatprep.subr.mxu1 %v2035_v20 }
  0xdf   :  { %1834 = vmatprep.mubr.msk.f32.mxu0 %vm51_vm0, %v300_v32  ;;  %1844 = vmatprep.mubr.msk.f32.mxu1 %vm51_vm0, %v385_v33 }
  0xe0   :  { %v1759_v34 = vpop.f32.mrf.mxu0  ;;  %v1769_v35 = vpop.f32.mrf.mxu1  ;;  %1835 = vmatmul.mubr.msk.f32.vlgmr.msra.gmra.mxu0 %vm51_vm0, %v1756_v30  ;;  %1845 = vmatmul.mubr.msk.f32.vlgmr.msra.gmra.mxu1 %vm51_vm0, %v1766_v31 }
  0xe1   :  { %1851 = vmatpush3.msra.mxu0 %v2035_v20  ;;  %1861 = vmatpush3.msra.mxu1 %v2035_v20 }
  0xe2   :  { %v310_v36 = vpop.f32.mrf.mxu0  ;;  %v395_v37 = vpop.f32.mrf.mxu1  ;;  %1852 = vmatprep.subr.mxu0 %v2054_v21  ;;  %1862 = vmatprep.subr.mxu1 %v2054_v21 }
  0xe3   :  { %1837 = vmatprep.mubr.msk.f32.mxu0 %vm51_vm0, %v310_v36  ;;  %1847 = vmatprep.mubr.msk.f32.mxu1 %vm51_vm0, %v395_v37 }
  0xe4   :  { %v1776_v38 = vpop.f32.mrf.mxu0  ;;  %v1786_v39 = vpop.f32.mrf.mxu1  ;;  %1838 = vmatmul.mubr.msk.f32.gmra.mxu0 %vm51_vm0, %v1759_v34  ;;  %1848 = vmatmul.mubr.msk.f32.gmra.mxu1 %vm51_vm0, %v1769_v35 }
  0xe5   :  { %1853 = vmatpush3.msra.mxu0 %v2054_v21  ;;  %1863 = vmatpush3.msra.mxu1 %v2054_v21 }
  0xe6   :  { %v470_v40 = vpop.f32.mrf.mxu0  ;;  %v555_v41 = vpop.f32.mrf.mxu1  ;;  %1870 = vmatprep.subr.mxu0 %v2035_v20  ;;  %1880 = vmatprep.subr.mxu1 %v2035_v20 }
  0xe7   :  { %1854 = vmatprep.mubr.msk.f32.mxu0 %vm51_vm0, %v470_v40  ;;  %1864 = vmatprep.mubr.msk.f32.mxu1 %vm51_vm0, %v555_v41 }
  0xe8   :  { %v1779_v42 = vpop.f32.mrf.mxu0  ;;  %v1789_v43 = vpop.f32.mrf.mxu1  ;;  %1855 = vmatmul.mubr.msk.f32.vlgmr.msra.gmra.mxu0 %vm51_vm0, %v1776_v38  ;;  %1865 = vmatmul.mubr.msk.f32.vlgmr.msra.gmra.mxu1 %vm51_vm0, %v1786_v39 }
  0xe9   :  { %1871 = vmatpush3.msra.mxu0 %v2035_v20  ;;  %1881 = vmatpush3.msra.mxu1 %v2035_v20 }
  0xea   :  { %v480_v44 = vpop.f32.mrf.mxu0  ;;  %v565_v45 = vpop.f32.mrf.mxu1  ;;  %1872 = vmatprep.subr.mxu0 %v2054_v21  ;;  %1882 = vmatprep.subr.mxu1 %v2054_v21 }
  0xeb   :  { %1857 = vmatprep.mubr.msk.f32.mxu0 %vm51_vm0, %v480_v44  ;;  %1867 = vmatprep.mubr.msk.f32.mxu1 %vm51_vm0, %v565_v45 }
  0xec   :  { %v1796_v46 = vpop.f32.mrf.mxu0  ;;  %v1806_v47 = vpop.f32.mrf.mxu1  ;;  %1858 = vmatmul.mubr.msk.f32.gmra.mxu0 %vm51_vm0, %v1779_v42  ;;  %1868 = vmatmul.mubr.msk.f32.gmra.mxu1 %vm51_vm0, %v1789_v43 }
  0xed   :  { %1873 = vmatpush3.msra.mxu0 %v2054_v21  ;;  %1883 = vmatpush3.msra.mxu1 %v2054_v21 }
  0xee   :  { %v640_v48 = vpop.f32.mrf.mxu0  ;;  %v725_v49 = vpop.f32.mrf.mxu1 }
  0xef   :  { %1874 = vmatprep.mubr.msk.f32.mxu0 %vm51_vm0, %v640_v48  ;;  %1884 = vmatprep.mubr.msk.f32.mxu1 %vm51_vm0, %v725_v49 }
  0xf0   :  { %v1799_v50 = vpop.f32.mrf.mxu0  ;;  %v1809_v51 = vpop.f32.mrf.mxu1  ;;  %1875 = vmatmul.mubr.msk.f32.vlgmr.msra.gmra.mxu0 %vm51_vm0, %v1796_v46  ;;  %1885 = vmatmul.mubr.msk.f32.vlgmr.msra.gmra.mxu1 %vm51_vm0, %v1806_v47 }
  0xf2   :  { %v650_v52 = vpop.f32.mrf.mxu0  ;;  %v735_v53 = vpop.f32.mrf.mxu1 }
  0xf3   :  { %1877 = vmatprep.mubr.msk.f32.mxu0 %vm51_vm0, %v650_v52  ;;  %1887 = vmatprep.mubr.msk.f32.mxu1 %vm51_vm0, %v735_v53 }
  0xf4   :  { %1878 = vmatmul.mubr.msk.f32.gmra.mxu0 %vm51_vm0, %v1799_v50  ;;  %1888 = vmatmul.mubr.msk.f32.gmra.mxu1 %vm51_vm0, %v1809_v51 }
 0x198   :  { %v1816_v54 = vpop.f32.mrf.mxu0  ;;  %v1826_v55 = vpop.f32.mrf.mxu1 }
 0x199   :  { %1522 = vst.msk [vmem:[#allocation5 + $0x8] sm:$0xff] %vm1520_vm1, %v1816_v54  ;;  %1526 = vst.msk [vmem:[#allocation5 + $0x28] sm:$0xff] %vm1520_vm1, %v1826_v55 }
 0x19a   :  { %v822_v56 = vpop.f32.mrf.mxu0  ;;  %v919_v57 = vpop.f32.mrf.mxu1 }
 0x19b   :  { %1521 = vst.msk [vmem:[#allocation5] sm:$0xff] %vm1520_vm1, %v822_v56  ;;  %1525 = vst.msk [vmem:[#allocation5 + $0x20] sm:$0xff] %vm1520_vm1, %v919_v57 }
 0x19c   :  { %v1819_v58 = vpop.f32.mrf.mxu0  ;;  %v1829_v59 = vpop.f32.mrf.mxu1 }
 0x19d   :  { %1524 = vst.msk [vmem:[#allocation5 + $0x18] sm:$0xff] %vm1520_vm1, %v1819_v58  ;;  %1528 = vst.msk [vmem:[#allocation5 + $0x38] sm:$0xff] %vm1520_vm1, %v1829_v59 }
 0x19e   :  { %v832_v60 = vpop.f32.mrf.mxu0  ;;  %v929_v61 = vpop.f32.mrf.mxu1 }
 0x19f   :  { %1523 = vst.msk [vmem:[#allocation5 + $0x10] sm:$0xff] %vm1520_vm1, %v832_v60  ;;  %1527 = vst.msk [vmem:[#allocation5 + $0x30] sm:$0xff] %vm1520_vm1, %v929_v61 }
 0x1a0   :  { %v1836_v62 = vpop.f32.mrf.mxu0  ;;  %v1846_v63 = vpop.f32.mrf.mxu1 }
 0x1a1   :  { %1530 = vst.msk [vmem:[#allocation5 + $0x48] sm:$0xff] %vm1520_vm1, %v1836_v62  ;;  %1534 = vst.msk [vmem:[#allocation5 + $0x68] sm:$0xff] %vm1520_vm1, %v1846_v63 }
 0x1a2   :  { %v1016_v0 = vpop.f32.mrf.mxu0  ;;  %v1113_v1 = vpop.f32.mrf.mxu1 }
 0x1a3   :  { %1529 = vst.msk [vmem:[#allocation5 + $0x40] sm:$0xff] %vm1520_vm1, %v1016_v0  ;;  %1533 = vst.msk [vmem:[#allocation5 + $0x60] sm:$0xff] %vm1520_vm1, %v1113_v1 }
 0x1a4   :  { %v1839_v2 = vpop.f32.mrf.mxu0  ;;  %v1849_v3 = vpop.f32.mrf.mxu1 }
 0x1a5   :  { %1532 = vst.msk [vmem:[#allocation5 + $0x58] sm:$0xff] %vm1520_vm1, %v1839_v2  ;;  %1536 = vst.msk [vmem:[#allocation5 + $0x78] sm:$0xff] %vm1520_vm1, %v1849_v3 }
 0x1a6   :  { %v1026_v4 = vpop.f32.mrf.mxu0  ;;  %v1123_v5 = vpop.f32.mrf.mxu1 }
 0x1a7   :  { %1531 = vst.msk [vmem:[#allocation5 + $0x50] sm:$0xff] %vm1520_vm1, %v1026_v4  ;;  %1535 = vst.msk [vmem:[#allocation5 + $0x70] sm:$0xff] %vm1520_vm1, %v1123_v5 }
 0x1a8   :  { %v1856_v6 = vpop.f32.mrf.mxu0  ;;  %v1866_v7 = vpop.f32.mrf.mxu1 }
 0x1a9   :  { %1538 = vst.msk [vmem:[#allocation5 + $0x88] sm:$0xff] %vm1520_vm1, %v1856_v6  ;;  %1542 = vst.msk [vmem:[#allocation5 + $0xa8] sm:$0xff] %vm1520_vm1, %v1866_v7 }
 0x1aa   :  { %v1210_v8 = vpop.f32.mrf.mxu0  ;;  %v1307_v9 = vpop.f32.mrf.mxu1 }
 0x1ab   :  { %1537 = vst.msk [vmem:[#allocation5 + $0x80] sm:$0xff] %vm1520_vm1, %v1210_v8  ;;  %1541 = vst.msk [vmem:[#allocation5 + $0xa0] sm:$0xff] %vm1520_vm1, %v1307_v9 }
 0x1ac   :  { %v1859_v10 = vpop.f32.mrf.mxu0  ;;  %v1869_v11 = vpop.f32.mrf.mxu1 }
 0x1ad   :  { %1540 = vst.msk [vmem:[#allocation5 + $0x98] sm:$0xff] %vm1520_vm1, %v1859_v10  ;;  %1544 = vst.msk [vmem:[#allocation5 + $0xb8] sm:$0xff] %vm1520_vm1, %v1869_v11 }
 0x1ae   :  { %v1220_v12 = vpop.f32.mrf.mxu0  ;;  %v1317_v13 = vpop.f32.mrf.mxu1 }
 0x1af   :  { %1539 = vst.msk [vmem:[#allocation5 + $0x90] sm:$0xff] %vm1520_vm1, %v1220_v12  ;;  %1543 = vst.msk [vmem:[#allocation5 + $0xb0] sm:$0xff] %vm1520_vm1, %v1317_v13 }
 0x1b0   :  { %v1876_v14 = vpop.f32.mrf.mxu0  ;;  %v1886_v15 = vpop.f32.mrf.mxu1 }
 0x1b1   :  { %1546 = vst.msk [vmem:[#allocation5 + $0xc8] sm:$0xff] %vm1520_vm1, %v1876_v14  ;;  %1550 = vst.msk [vmem:[#allocation5 + $0xe8] sm:$0xff] %vm1520_vm1, %v1886_v15 }
 0x1b2   :  { %v1404_v16 = vpop.f32.mrf.mxu0  ;;  %v1501_v17 = vpop.f32.mrf.mxu1 }
 0x1b3   :  { %1545 = vst.msk [vmem:[#allocation5 + $0xc0] sm:$0xff] %vm1520_vm1, %v1404_v16  ;;  %1549 = vst.msk [vmem:[#allocation5 + $0xe0] sm:$0xff] %vm1520_vm1, %v1501_v17 }
 0x1b4   :  { %v1879_v18 = vpop.f32.mrf.mxu0  ;;  %v1889_v19 = vpop.f32.mrf.mxu1 }
 0x1b5   :  { %1548 = vst.msk [vmem:[#allocation5 + $0xd8] sm:$0xff] %vm1520_vm1, %v1879_v18  ;;  %1552 = vst.msk [vmem:[#allocation5 + $0xf8] sm:$0xff] %vm1520_vm1, %v1889_v19 }
 0x1b6   :  { %v1414_v20 = vpop.f32.mrf.mxu0  ;;  %v1511_v21 = vpop.f32.mrf.mxu1 }
 0x1b7   :  { %1547 = vst.msk [vmem:[#allocation5 + $0xd0] sm:$0xff] %vm1520_vm1, %v1414_v20  ;;  %1551 = vst.msk [vmem:[#allocation5 + $0xf0] sm:$0xff] %vm1520_vm1, %v1511_v21 }
 0x1b8   :  { %1925 = shalt.err (!%p1922_p9)
}
 0x1b9   :  { %1564 = dma.vmem_to_hbm [thread:$0]  %s1559_s29, 4096, %s2157_s3, [#allocation4], %s1939_s15, %s1939_s15, %s1940_s16  }
 0x1ba   :  { %1936 = dma.done.wait [#allocation4], 4096  }
 0x1bb   :  { %1937 = vsyncadd [#allocation4], 4294963200 }
 0x1bc   :  { %1568 = vsyncpa [#allocation3], 1 }
 0x1bd   :  { %1569 = vsyncpa [#allocation4], 1 }

</bundles_post_ra>
